<compile_context>
chip_gen: v5e
topology: v5e:2x2
jax: 0.10.0
libtpu: 0.0.40
codegen_flags: <defaults>
</compile_context>

<pallas_src>
import functools

import jax
import jax.numpy as jnp
from jax.experimental import pallas as pl
from jax.experimental.pallas import tpu as pltpu

_LANE = 128                       # TPU lane width (last tensor dim)
_SUBLANE = 8                      # sublane granularity (second-minor dim)
_VMEM_BUDGET = 24 * 1024 * 1024   # pipeline-buffer budget; safe under every gen's scoped VMEM
_TM_MAX = 2048                    # cap on patch-matrix columns per grid step


def _round_up(x, m):
    return (x + m - 1) // m * m


def _conv_gemm_kernel(pt_ref, w_ref, b_ref, o_ref):
    """One M-tile of: out_T = relu(W @ patches_T + b)  (transposed GEMM).

    pt_ref: (K, TM)          bf16 im2col patch tile (M in lanes -> lane-dense)
    w_ref:  (C_out_pad, K)   bf16, resident across the whole grid
    b_ref:  (C_out_pad, 1)   f32,  resident across the whole grid
    o_ref:  (C_out_pad, TM)  f32,  lane-dense output tile (no C_out lane padding)
    """
    acc = jnp.dot(w_ref[...], pt_ref[...], preferred_element_type=jnp.float32)
    acc = acc + b_ref[...]                                    # bias lane-broadcast over TM
    o_ref[...] = jnp.maximum(acc, 0.0).astype(o_ref.dtype)    # ReLU on the VPU (free filler)


def _im2col_t(x_pad, kh, kw, stride, h_out, w_out):
    """(N, C, Hp, Wp) -> (C*kh*kw, N*h_out*w_out); K order (c, ki, kj) = PyTorch order.

    Built directly in transposed (K, M) layout: only a leading-axis swap of the
    (input-sized) padded image plus strided tap slices — no big 6-D transpose and
    no extra (M, K) -> (K, M) transpose afterwards.
    """
    n, c, _, _ = x_pad.shape
    x_cn = jnp.transpose(x_pad, (1, 0, 2, 3))                  # (C, N, Hp, Wp)
    taps = []
    for ki in range(kh):
        for kj in range(kw):
            taps.append(x_cn[:, :,
                             ki:ki + stride * h_out:stride,
                             kj:kj + stride * w_out:stride])   # (C, N, ho, wo)
    pt = jnp.stack(taps, axis=1)                               # (C, kh*kw, N, ho, wo)
    return pt.reshape(c * kh * kw, n * h_out * w_out)          # (K, M)


@functools.partial(jax.jit, static_argnames=("stride", "padding", "tm"))
def conv2d_block(x, weight, bias, *, stride, padding, tm=None):
    """Forward of Conv2dBlock(norm='none', activation='relu', pad_type='zero').

    x:      (N, C_in, H, W)          float32, NCHW
    weight: (C_out, C_in, kH, kW)    float32
    bias:   (C_out,)                 float32
    returns (N, C_out, H_out, W_out) float32
    """
    n, c_in, h, w = x.shape
    c_out, _, kh, kw = weight.shape

    # nn.ZeroPad2d(padding); cast to bf16 here so all im2col glue moves half the bytes.
    x_pad = jnp.pad(x, ((0, 0), (0, 0), (padding, padding), (padding, padding)))
    x_pad = x_pad.astype(jnp.bfloat16)
    hp, wp = h + 2 * padding, w + 2 * padding
    h_out = (hp - kh) // stride + 1
    w_out = (wp - kw) // stride + 1

    # im2col glue, built directly in transposed (K, M) layout.
    # TODO(synk): fold the kh*kw tap accumulation into the kernel (reduction grid
    # axis + shifted index_maps into a padded NHWC copy of x, f32 VMEM accumulator)
    # to remove the kh*kw x input re-read; kept wrapper-side im2col for robustness.
    patches_t = _im2col_t(x_pad, kh, kw, stride, h_out, w_out)   # (K, M) bf16
    k, m = patches_t.shape

    # Transposed GEMM: out_T (C_out, M) = W (C_out, K) @ patches_T (K, M).
    # M (large) sits in lanes -> unmasked lane-dense stores without padding C_out
    # up to 128; C_out only pads to the sublane granule. K stays unpadded
    # (full-extent second-minor / last block dims are legal).
    c_out_pad = _round_up(c_out, _SUBLANE)

    # Derive TM from the VMEM budget (v7x-safe) instead of sweeping blindly.
    w_bytes = 2 * c_out_pad * k * 2            # bf16 weight, double-buffered (constant index)
    b_bytes = 2 * c_out_pad * 4                # f32 bias, double-buffered
    per_tm = 2 * k * 2 + 2 * c_out_pad * 4     # patch (bf16) + out (f32), both double-buffered
    avail = max(_VMEM_BUDGET - w_bytes - b_bytes, per_tm * _LANE)
    tm_auto = max(_LANE, min(_TM_MAX, (avail // per_tm) // _LANE * _LANE))
    tm = tm_auto if tm is None else max(_LANE, _round_up(int(tm), _LANE))

    m_lane = _round_up(m, _LANE)
    tm = min(tm, m_lane)
    if tm >= m_lane and m_lane >= 2 * _LANE:
        # keep >= 2 grid steps so ("parallel",) can shard across both v7x TensorCores
        tm = _round_up((m_lane + 1) // 2, _LANE)
    m_pad = _round_up(m, tm)
    grid_m = m_pad // tm

    # bf16 MXU operands (f32 accumulate in the kernel); bias stays f32.
    patches_p = jnp.pad(patches_t, ((0, 0), (0, m_pad - m)))               # (K, M_pad) bf16
    w_mat = weight.reshape(c_out, c_in * kh * kw)                          # (C_out, K), K=(c,ki,kj)
    w_p = jnp.pad(w_mat, ((0, c_out_pad - c_out), (0, 0))).astype(jnp.bfloat16)
    b_p = jnp.pad(bias, (0, c_out_pad - c_out)).reshape(c_out_pad, 1).astype(jnp.float32)

    # Advisory cost for XLA scheduling, using the REAL (unpadded) problem sizes.
    cost = pl.CostEstimate(
        flops=2 * m * k * c_out,
        transcendentals=0,
        bytes_accessed=2 * (m * k + k * c_out) + 4 * (c_out + m * c_out),
    )

    out_t = pl.pallas_call(
        _conv_gemm_kernel,
        out_shape=jax.ShapeDtypeStruct((c_out_pad, m_pad), jnp.float32),
        grid_spec=pltpu.PrefetchScalarGridSpec(
            num_scalar_prefetch=0,
            grid=(grid_m,),
            in_specs=[
                # patch tile streams over M (double-buffered by the pipeline)
                pl.BlockSpec((k, tm), lambda i: (0, i)),
                # weight / bias stay resident in VMEM across all M tiles
                pl.BlockSpec((c_out_pad, k), lambda i: (0, 0)),
                pl.BlockSpec((c_out_pad, 1), lambda i: (0, 0)),
            ],
            out_specs=pl.BlockSpec((c_out_pad, tm), lambda i: (0, i)),
        ),
        compiler_params=pltpu.CompilerParams(
            # M tiles are independent -> shardable across both v7x TensorCores.
            dimension_semantics=("parallel",),
            # Budget above targets ~24 MiB; 32 MiB scoped limit is safe on v5e/v6e/v7x.
            vmem_limit_bytes=32 * 1024 * 1024,
        ),
        cost_estimate=cost,
    )(patches_p, w_p, b_p)

    # Slice off C_out / M padding; (C_out, M) -> (C_out, N, Ho, Wo) -> leading-axis swap -> NCHW.
    out = out_t[:c_out, :m].reshape(c_out, n, h_out, w_out)
    return jnp.transpose(out, (1, 0, 2, 3))


if __name__ == "__main__":
    # Conv2dBlock(input_dim=4, output_dim=8, kernel_size=3, stride=1, padding=1)
    N, C_IN, H, W = 2, 4, 16, 16
    C_OUT, KH, KW = 8, 3, 3
    STRIDE, PADDING = 1, 1

    key = jax.random.PRNGKey(0)
    kx, kw_, kb = jax.random.split(key, 3)

    x = jax.random.normal(kx, (N, C_IN, H, W), dtype=jnp.float32)
    # deterministic synthetic parameters (shapes match nn.Conv2d(4, 8, 3, 1, bias=True))
    fan_in = C_IN * KH * KW
    bound = 1.0 / (fan_in ** 0.5)
    weight = jax.random.uniform(kw_, (C_OUT, C_IN, KH, KW),
                                minval=-bound, maxval=bound, dtype=jnp.float32)
    bias = jax.random.uniform(kb, (C_OUT,),
                              minval=-bound, maxval=bound, dtype=jnp.float32)

    out = conv2d_block(x, weight, bias, stride=STRIDE, padding=PADDING)
    out = jax.block_until_ready(out)

    # sanity check against XLA conv reference (full f32)
    ref = jax.lax.conv_general_dilated(
        jnp.pad(x, ((0, 0), (0, 0), (PADDING, PADDING), (PADDING, PADDING))),
        weight, (STRIDE, STRIDE), "VALID",
        dimension_numbers=("NCHW", "OIHW", "NCHW"))
    ref = jnp.maximum(ref + bias.reshape(1, C_OUT, 1, 1), 0.0)
    assert out.shape == (N, C_OUT, H, W), out.shape
    # bf16 MXU inputs with f32 accumulation: tolerance relaxed vs the f32 reference.
    err = float(jnp.max(jnp.abs(out - ref)))
    assert jnp.allclose(out, ref, atol=3e-2, rtol=3e-2), err

    # TODO(synk): norm branches ('bn'/'in'/'ln') and the non-relu activations of
    # Conv2dBlock are not exercised by the default config and are omitted.
    print("KERNEL_OK")
</pallas_src>

<mosaic_0001>
module attributes {stable_mosaic.version = 11 : i64} {
  func.func @_conv_gemm_kernel(%arg0: i32, %arg1: memref<36x256xbf16, #tpu.memory_space<vmem>>, %arg2: memref<8x36xbf16, #tpu.memory_space<vmem>>, %arg3: memref<8x1xf32, #tpu.memory_space<vmem>>, %arg4: memref<8x256xf32, #tpu.memory_space<vmem>>) attributes {dimension_semantics = [#tpu.dimension_semantics<parallel>], iteration_bounds = array<i64: 2>, scalar_prefetch = 0 : i64, scratch_operands = 0 : i64, tpu.core_type = #tpu.core_type<tc>, window_params = [{transform_indices = @transform_0, window_bounds = array<i64: 36, 256>}, {pipeline_mode = #tpu.pipeline_mode<synchronous>, transform_indices = @transform_1, window_bounds = array<i64: 8, 36>}, {pipeline_mode = #tpu.pipeline_mode<synchronous>, transform_indices = @transform_2, window_bounds = array<i64: 8, 1>}, {transform_indices = @transform_3, window_bounds = array<i64: 8, 256>}]} {
    %c0 = arith.constant 0 : index
    %c0_0 = arith.constant 0 : index
    %0 = vector.load %arg2[%c0, %c0_0] : memref<8x36xbf16, #tpu.memory_space<vmem>>, vector<8x36xbf16>
    %c0_1 = arith.constant 0 : index
    %c0_2 = arith.constant 0 : index
    %1 = vector.load %arg1[%c0_1, %c0_2] : memref<36x256xbf16, #tpu.memory_space<vmem>>, vector<36x256xbf16>
    %cst = arith.constant dense<0.000000e+00> : vector<8x256xf32>
    %2 = tpu.matmul %0, %1, %cst {dimension_numbers = #tpu.dot_dimension_numbers<[1], [0], [0], [1], [0, 0, 1, 1], [], []>} : vector<8x36xbf16>, vector<36x256xbf16>, vector<8x256xf32> -> vector<8x256xf32>
    %c0_3 = arith.constant 0 : index
    %c0_4 = arith.constant 0 : index
    %3 = vector.load %arg3[%c0_3, %c0_4] : memref<8x1xf32, #tpu.memory_space<vmem>>, vector<8x1xf32>
    %4 = vector.broadcast %3 : vector<8x1xf32> to vector<8x256xf32>
    %5 = arith.addf %2, %4 : vector<8x256xf32>
    %cst_5 = arith.constant 0.000000e+00 : f32
    %6 = vector.broadcast %cst_5 : f32 to vector<8x256xf32>
    %7 = arith.maximumf %5, %6 : vector<8x256xf32>
    %c0_6 = arith.constant 0 : index
    %c0_7 = arith.constant 0 : index
    %8 = vector.load %arg4[%c0_6, %c0_7] : memref<8x256xf32, #tpu.memory_space<vmem>>, vector<8x256xf32>
    tpu.vector_store %arg4[%c0_6, %c0_7], %7 {strides = array<i32>} : memref<8x256xf32, #tpu.memory_space<vmem>>, vector<8x256xf32>,
    return
  }
  func.func @transform_0(%arg0: i32) -> (i32, i32) {
    %c0_i32 = arith.constant 0 : i32
    %c0_i32_0 = arith.constant 0 : i32
    return %c0_i32, %arg0 : i32, i32
  }
  func.func @transform_1(%arg0: i32) -> (i32, i32) {
    %c0_i32 = arith.constant 0 : i32
    %c0_i32_0 = arith.constant 0 : i32
    %c0_i32_1 = arith.constant 0 : i32
    return %c0_i32, %c0_i32_0 : i32, i32
  }
  func.func @transform_2(%arg0: i32) -> (i32, i32) {
    %c0_i32 = arith.constant 0 : i32
    %c0_i32_0 = arith.constant 0 : i32
    %c0_i32_1 = arith.constant 0 : i32
    return %c0_i32, %c0_i32_0 : i32, i32
  }
  func.func @transform_3(%arg0: i32) -> (i32, i32) {
    %c0_i32 = arith.constant 0 : i32
    %c0_i32_0 = arith.constant 0 : i32
    return %c0_i32, %arg0 : i32, i32
  }
}

</mosaic_0001>

<bundles_post_ra>
// kernel: conv2d_block.1
= control target key start
LH: loop header
LB: loop body
LE: loop exit
PB: predicated region body
PF: predicated region fallthrough
CT: control target
= control target key end

     0   :  { %s473_s12 = smov 0   ;;  %s475_s13 = smov 0   ;;  %s531_s0 = inlined_call_operand.vmem [shape: bf16[36,512], index: 0, kind: input, shape index: {}]   ;;  %s532_s1 = inlined_call_operand.vmem [shape: bf16[8,36], index: 1, kind: input, shape index: {}]   ;;  %s533_s2 = inlined_call_operand.vmem [shape: f32[8,1], index: 2, kind: input, shape index: {}]   ;;  %s534_s3 = inlined_call_operand.vmem [shape: f32[8,512], index: 3, kind: output, shape index: {}]  }
   0x1   :  { %s477_s14 = smov 0  }
   0x2 LB: > { %s366_s15 = sadd.s32 4294967295, %s450_s14   ;;  %s490_s16 = sadd.s32 1, %s450_s14   ;;  %s450_s14 = sphi %s477_s14, %s537_s14   ;;  %s446_s13 = sphi %s475_s13, %s536_s13   ;;  %s442_s12 = sphi %s473_s12, %s535_s12  }
   0x3   : > { %s17_s17 = ssub.s32 %s450_s14, %s490_s16  ;;  %s20_s18 = sadd.s32 1, %s446_s13 }
   0x4   : > { %p18_p0 = scmp.eq.s32.totalorder %s17_s17, 0  ;;  %p27_p1 = scmp.ne.s32.totalorder %s446_s13, %s442_s12 }
   0x5   : > { %p28_p2 = scmp.eq.s32.totalorder %s450_s14, 0  ;;  %p369_p4 = scmp.ge.s32.totalorder %s450_s14, 2 }
   0x6   : > { %s499_s19 = scalar_select %p18_p0, %s446_s13, %s20_s18  }
   0x7   : > { %p29_p3 = por %p28_p2, %p27_p1  ;;  %127 = sbr.rel (%p369_p4) target bundleno = 21 (0x15), region = 24 }
   0xc   : > { %130 = sbr.rel (!%p29_p3) target bundleno = 21 (0x15), region = 28  ;;  %s132_s20 = sand.u32 (%p29_p3), 1, %s446_s13  }
   0xd   : > { %s395_s21 = sshll.u32 (%p29_p3), %s450_s14, 3  ;;  %s400_s22 = smul.u32 (%p29_p3), 40, %s132_s20 }
   0xe   : > { %s137_s25 = scalar_lea.vmem (%p29_p3), %s531_s0, %s395_s21 }
   0xf   : > { %v174_v0 = vld [vmem:[%s137_s25] sm:$0xff] (%p29_p3)  ;;  %v176_v1 = vld [vmem:[%s137_s25 + $0x10] sm:$0xff] (%p29_p3)  ;;  %s134_s26 = scalar_lea.vmem (%p29_p3), [#allocation2], %s400_s22 }
  0x10   : > { %v178_v2 = vld [vmem:[%s137_s25 + $0x20] sm:$0xff] (%p29_p3)  ;;  %175 = vst [vmem:[%s134_s26] sm:$0xff] (%p29_p3), %v174_v0  ;;  %v180_v3 = vld [vmem:[%s137_s25 + $0x30] sm:$0xff] (%p29_p3) }
  0x11   : > { %177 = vst [vmem:[%s134_s26 + $0x8] sm:$0xff] %v176_v1  ;;  %v182_v4 = vld [vmem:[%s137_s25 + $0x40] sm:$0xff] }
  0x12   : > { %179 = vst [vmem:[%s134_s26 + $0x10] sm:$0xff] %v178_v2 }
  0x13   : > { %181 = vst [vmem:[%s134_s26 + $0x18] sm:$0xff] %v180_v3 }
  0x14   : > { %183 = vst [vmem:[%s134_s26 + $0x20] sm:$0xff] %v182_v4 }
  0x15 PF: > { %p372_p5 = scmp.ge.s32.totalorder %s450_s14, 1  ;;  %p188_p6 = scmp.lt.s32.totalorder %s450_s14, 3 }
  0x17   : > { %p189_p7 = pnand %p372_p5, %p188_p6 }
  0x18   : > { %s195_s27 = sand.u32 (!%p189_p7), 1, %s442_s12   ;;  %s373_s7 = sshll.u32 (!%p189_p7), %s366_s15, 1 }
  0x19   : > { %192 = sbr.rel (%p189_p7) target bundleno = 182 (0xb6), region = 66  ;;  %p220_p8 = scmp.lt.s32.totalorder (!%p189_p7), %s373_s7, 3 }
  0x1a   : > { %s401_s28 = smul.u32 (!%p189_p7), 40, %s195_s27 }
  0x1c   : > { %s197_s4 = scalar_lea.vmem (!%p189_p7), [#allocation2], %s401_s28 }
  0x1e   : > { %v452_v5 = vmov 0   ;;  %v232_v6 = vld [vmem:[%s533_s2] sm:$0xff]  ;;  %vm267_vm0 = vcmask 1041408   ;;  %v385_v10 = vld [vmem:[%s197_s4 + $0x10] sm:$0xf]  ;;  %vm263_vm1 = vcmask 293888  }
  0x1f   : > { %427 = vset.pattern.permute.xlu0 %v452_v5  ;;  %v231_v7 = vld [vmem:[%s197_s4 + $0x20] sm:$0x33]  ;;  %v399_v13 = vld [vmem:[%s197_s4 + $0x14] sm:$0xf0]  ;;  %v398_v14 = vld [vmem:[%s197_s4 + $0x14] sm:$0xf] }
  0x20   : > { %235 = vperm.xlu0 %427, %v232_v6   ;;  %v251_v8 = vunpack.c.l.b16 %v231_v7  ;;  %v252_v9 = vunpack.c.h.b16 %v231_v7  ;;  %v387_v15 = vld [vmem:[%s197_s4 + $0x18] sm:$0xf0]  ;;  %v386_v18 = vor.u32 %v399_v13, %v385_v10  ;;  %v377_v20 = vld [vmem:[%s197_s4] sm:$0xf]  ;;  %v397_v21 = vld [vmem:[%s197_s4 + $0x4] sm:$0xf0] }
  0x21   : > { %v390_v19 = vor.u32 %v398_v14, %v387_v15  ;;  %v396_v22 = vld [vmem:[%s197_s4 + $0x4] sm:$0xf]  ;;  %v379_v23 = vld [vmem:[%s197_s4 + $0x8] sm:$0xf0]  ;;  %v378_v24 = vor.u32 %v397_v21, %v377_v20  ;;  %v226_v26 = vld [vmem:[%s532_s1] sm:$0xf] }
  0x22   : > { %v257_v11 = vpack.c.b16 %v251_v8, %v251_v8  ;;  %v258_v12 = vpack.c.b16 %v252_v9, %v252_v9  ;;  %v382_v25 = vor.u32 %v396_v22, %v379_v23  ;;  %s539_s7 = smov (!%p220_p8, %s373_s7), 3 }
  0x23   : > { %s374_s8 = sshll.u32 %s539_s7, 3 }
  0x24   : > { %v269_v16 = vsel %vm267_vm0, %v257_v11, 0  ;;  %v272_v17 = vsel %vm267_vm0, %v258_v12, 0  ;;  %s223_s11 = scalar_lea.vmem %s534_s3, %s374_s8 }
  0x25   : > { %279 = vmatpush.bf16.msra.mxu0 %v269_v16  ;;  %292 = vmatpush.bf16.msra.mxu1 %v272_v17 }
  0x29   : > { %280 = vmatpush.bf16.msra.mxu0 %v386_v18  ;;  %293 = vmatpush.bf16.msra.mxu1 %v390_v19 }
  0x2d   : > { %281 = vmatpush.bf16.msra.mxu0 %v378_v24  ;;  %294 = vmatpush.bf16.msra.mxu1 %v382_v25 }
  0x30   : > { %391 = vmatmul.msk.bf16.vlgmr.msra.gmra.mxu0 %vm263_vm1, %v226_v26  ;;  %392 = vmatmul.msk.bf16.vlgmr.msra.gmra.mxu1 %vm263_vm1, %v226_v26 }
  0x92   : > { %v236_v27 = vpop.permute.xlu0 %235 }
  0xad   : > { %v283_v28 = vpop.f32.mrf.mxu0  ;;  %v296_v29 = vpop.f32.mrf.mxu1 }
  0xae   : > { %v284_v30 = vadd.f32 %v283_v28, %v236_v27  ;;  %v297_v31 = vadd.f32 %v296_v29, %v236_v27 }
  0xb0   : > { %v300_v32 = vmax.f32 %v284_v30, 0.0  ;;  %v301_v33 = vmax.f32 %v297_v31, 0.0 }
  0xb2   : > { %302 = vst [vmem:[%s223_s11] sm:$0xff] %v300_v32 }
  0xb3   : > { %303 = vst [vmem:[%s223_s11 + $0x8] sm:$0xff] %v301_v33 }
  0xb5   : > { %v285_v34 = vpop.f32.mrf.mxu0  ;;  %v298_v35 = vpop.f32.mrf.mxu1 }
  0xb6 PF: > { %p10_p9 = scmp.ge.s32.totalorder %s490_s16, 4   ;;  %s535_s12 = smov %s446_s13 }
  0xb7   : > { %s536_s13 = smov %s499_s19  ;;  %s537_s14 = smov %s490_s16 }
  0xb8   :  { %12 = sbr.rel (!%p10_p9) target bundleno = 2 (0x2), region = 105 }

</bundles_post_ra>
